<compile_context>
chip_gen: v7x
topology: tpu7x:2x2x1
jax: 0.10.0
libtpu: 0.0.40
codegen_flags: <defaults>
</compile_context>

<pallas_src>
import functools
import math

import jax
import jax.numpy as jnp
from jax.experimental import pallas as pl
from jax.experimental.pallas import tpu as pltpu


def _round_up(n, m):
    return ((n + m - 1) // m) * m


# ----------------------------------------------------------------------------
# Fused kernel: 3 matmuls (actor+critic fused) + distribution math.
# Inputs per tile:  x (T, obs_pad) f32, eps (T, 8) f32.
# Output per tile:  (T, 8) f32 packed as
#   lanes [0, act)   : action = mean + std * eps
#   lane  act        : logprob  (sum over action dims)
#   lane  act + 1    : entropy  (sum over action dims, batch-independent)
#   lane  act + 2    : value
# ----------------------------------------------------------------------------
def _ppo_fused_kernel(x_ref, eps_ref, w_ref, n_ref, out_ref, *, obs_pad, hidden):
    H2 = 2 * hidden  # 128: fused (actor|critic) hidden width

    # Wide slab (128 lanes): layer-1 (concat), layer-2 (block-diag), bias rows.
    w1 = w_ref[0:obs_pad, :]                        # (obs_pad, 128)
    w2 = w_ref[obs_pad:obs_pad + H2, :]             # (128, 128)
    brows = w_ref[obs_pad + H2:obs_pad + H2 + 8, :]  # (8, 128)
    b1 = brows[0:1, :]
    b2 = brows[1:2, :]

    # Narrow slab (8 lanes): fused head + packed parameter rows.
    w3 = n_ref[0:H2, :]                             # (128, 8) padded head
    prow = n_ref[H2:H2 + 8, :]                      # (8, 8)
    b3 = prow[0:1, :]       # actor bias | logprob const | entropy | critic bias
    std_row = prow[1:2, :]  # exp(logstd) in action lanes, 0 elsewhere
    lp_one = prow[2:3, :]   # 1.0 at the logprob lane, 0 elsewhere

    x = x_ref[...]
    eps = eps_ref[...]      # zero outside action lanes (wrapper invariant)

    h = jnp.maximum(jnp.dot(x, w1, preferred_element_type=jnp.float32) + b1, 0.0)
    h = jnp.maximum(jnp.dot(h, w2, preferred_element_type=jnp.float32) + b2, 0.0)
    out = jnp.dot(h, w3, preferred_element_type=jnp.float32) + b3
    # out: action mean in [0,act), logprob/entropy constants, value in act+2.

    # action lanes: mean + std * eps  (std_row is zero outside action lanes,
    # so the logprob / entropy / value lanes are untouched).
    out = out + std_row * eps

    # logprob variable part: -0.5 * sum(eps^2); padded eps lanes contribute 0.
    lp_var = jnp.sum(-0.5 * (eps * eps), axis=1, keepdims=True)   # (T, 1)
    out_ref[...] = out + lp_var * lp_one


# ----------------------------------------------------------------------------
# Parameter packing.
#   wide   : (obs_pad + 128 + 8, 128) f32  -- w1 | w2 | bias rows
#   narrow : (128 + 8, 8)          f32  -- w3 | {b3+consts, exp(logstd), onehot}
# ----------------------------------------------------------------------------
def pack_weights(params, obs_dim, act_dim, hidden=64):
    pack = 2 * hidden            # 128: fused hidden width
    npack = 8                    # narrow packed-output width
    assert act_dim + 3 <= npack, "packed output width too small"
    obs_pad = _round_up(obs_dim, 8)
    lsp = 0.5 * math.log(2.0 * math.pi)
    logstd = params["logstd"][0]                       # (act_dim,)

    w1 = jnp.zeros((obs_pad, pack), jnp.float32)
    w1 = w1.at[:obs_dim, :hidden].set(params["aw1"])
    w1 = w1.at[:obs_dim, hidden:].set(params["cw1"])

    w2 = jnp.zeros((pack, pack), jnp.float32)
    w2 = w2.at[:hidden, :hidden].set(params["aw2"])
    w2 = w2.at[hidden:, hidden:].set(params["cw2"])

    brows = jnp.zeros((8, pack), jnp.float32)
    brows = brows.at[0, :hidden].set(params["ab1"][0])
    brows = brows.at[0, hidden:].set(params["cb1"][0])
    brows = brows.at[1, :hidden].set(params["ab2"][0])
    brows = brows.at[1, hidden:].set(params["cb2"][0])

    wide = jnp.concatenate([w1, w2, brows], axis=0)    # (obs_pad + 136, 128)

    w3 = jnp.zeros((pack, npack), jnp.float32)
    w3 = w3.at[:hidden, :act_dim].set(params["aw3"])
    w3 = w3.at[hidden:, act_dim + 2].set(params["cw3"][:, 0])
    # NOTE: w3 columns act_dim and act_dim+1 stay exactly zero; the logprob /
    # entropy constants are folded ONLY into b3 below.

    prow = jnp.zeros((8, npack), jnp.float32)
    prow = prow.at[0, :act_dim].set(params["ab3"][0])
    prow = prow.at[0, act_dim].set(-(jnp.sum(logstd) + act_dim * lsp))   # logprob const
    prow = prow.at[0, act_dim + 1].set(jnp.sum(0.5 + lsp + logstd))      # entropy
    prow = prow.at[0, act_dim + 2].set(params["cb3"][0, 0])
    prow = prow.at[1, :act_dim].set(jnp.exp(logstd))                     # std
    prow = prow.at[2, act_dim].set(1.0)                                  # lp one-hot

    narrow = jnp.concatenate([w3, prow], axis=0)       # (136, 8)
    return wide, narrow, obs_pad, npack


# ----------------------------------------------------------------------------
# Wrapper: batch-gridded pallas_call; narrow packed output sliced here.
# ----------------------------------------------------------------------------
def ppo_agent_forward(params, x, eps, *, tile_b=1024):
    """Returns (action, logprob, entropy, value) matching PPOAgent.forward."""
    B, obs_dim = x.shape
    act_dim = eps.shape[1]
    hidden = params["aw1"].shape[1]

    wide, narrow, obs_pad, npack = pack_weights(params, obs_dim, act_dim, hidden)

    # Big batch tiles amortize the ~0.35us/step grid overhead; keep >= 2 grid
    # steps when the batch allows so the "parallel" axis spans both v7x cores.
    tile_b = max(8, _round_up(min(tile_b, B), 8))
    if B > 8 and _round_up(B, tile_b) // tile_b < 2:
        tile_b = _round_up((B + 1) // 2, 8)
    b_pad = _round_up(B, tile_b)
    grid = (b_pad // tile_b,)

    x_p = jnp.zeros((b_pad, obs_pad), jnp.float32).at[:B, :obs_dim].set(x)
    # eps at natural 8-lane width; lanes >= act_dim MUST stay zero (kernel
    # relies on this for the logprob sum and the untouched packed lanes).
    eps_p = jnp.zeros((b_pad, npack), jnp.float32).at[:B, :act_dim].set(eps)

    kernel = functools.partial(_ppo_fused_kernel, obs_pad=obs_pad, hidden=hidden)

    out = pl.pallas_call(
        kernel,
        out_shape=jax.ShapeDtypeStruct((b_pad, npack), jnp.float32),
        grid_spec=pltpu.PrefetchScalarGridSpec(
            num_scalar_prefetch=0,
            grid=grid,
            in_specs=[
                pl.BlockSpec((tile_b, obs_pad), lambda i: (i, 0)),
                pl.BlockSpec((tile_b, npack), lambda i: (i, 0)),
                # weight slabs: constant block index -> fetched once, VMEM-resident
                pl.BlockSpec(wide.shape, lambda i: (0, 0)),
                pl.BlockSpec(narrow.shape, lambda i: (0, 0)),
            ],
            out_specs=pl.BlockSpec((tile_b, npack), lambda i: (i, 0)),
        ),
        compiler_params=pltpu.CompilerParams(
            dimension_semantics=("parallel",),       # megacore-shard batch on v7x
            vmem_limit_bytes=32 * 1024 * 1024,       # safe on v5e/v6e/v7x
        ),
    )(x_p, eps_p, wide, narrow)

    action = out[:B, :act_dim]
    logprob = out[:B, act_dim]
    entropy = out[:B, act_dim + 1]
    value = out[:B, act_dim + 2:act_dim + 3]
    return action, logprob, entropy, value


# ----------------------------------------------------------------------------
# Deterministic parameter init (mirrors layer_init: orthogonal weight, const bias)
# ----------------------------------------------------------------------------
def _orthogonal(key, fan_in, fan_out, std):
    a = jax.random.normal(key, (max(fan_in, fan_out), min(fan_in, fan_out)),
                          dtype=jnp.float32)
    q, r = jnp.linalg.qr(a)
    q = q * jnp.sign(jnp.diagonal(r))[None, :]
    if fan_in < fan_out:
        q = q.T
    return (std * q[:fan_in, :fan_out]).astype(jnp.float32)


def make_params(key, obs_dim, act_dim, hidden=64):
    ks = jax.random.split(key, 6)
    sqrt2 = math.sqrt(2.0)
    return {
        # actor
        "aw1": _orthogonal(ks[0], obs_dim, hidden, sqrt2),
        "ab1": jnp.zeros((1, hidden), jnp.float32),
        "aw2": _orthogonal(ks[1], hidden, hidden, sqrt2),
        "ab2": jnp.zeros((1, hidden), jnp.float32),
        "aw3": _orthogonal(ks[2], hidden, act_dim, 0.01),
        "ab3": jnp.zeros((1, act_dim), jnp.float32),
        "logstd": jnp.zeros((1, act_dim), jnp.float32),
        # critic
        "cw1": _orthogonal(ks[3], obs_dim, hidden, sqrt2),
        "cb1": jnp.zeros((1, hidden), jnp.float32),
        "cw2": _orthogonal(ks[4], hidden, hidden, sqrt2),
        "cb2": jnp.zeros((1, hidden), jnp.float32),
        "cw3": _orthogonal(ks[5], hidden, 1, 1.0),
        "cb3": jnp.zeros((1, 1), jnp.float32),
    }


# ----------------------------------------------------------------------------
# Pure-JAX reference (faithful translation of the PyTorch forward)
# ----------------------------------------------------------------------------
def _reference(params, x, eps):
    relu = lambda v: jnp.maximum(v, 0.0)
    h = relu(x @ params["aw1"] + params["ab1"])
    h = relu(h @ params["aw2"] + params["ab2"])
    mean = h @ params["aw3"] + params["ab3"]
    std = jnp.exp(params["logstd"])
    action = mean + std * eps
    lsp = 0.5 * math.log(2.0 * math.pi)
    lp = (-((action - mean) ** 2) / (2.0 * std ** 2) - params["logstd"] - lsp).sum(1)
    ent = jnp.broadcast_to(0.5 + lsp + params["logstd"], mean.shape).sum(1)
    hc = relu(x @ params["cw1"] + params["cb1"])
    hc = relu(hc @ params["cw2"] + params["cb2"])
    val = hc @ params["cw3"] + params["cb3"]
    return action, lp, ent, val


if __name__ == "__main__":
    B, OBS_DIM, ACT_DIM = 64, 16, 4

    root = jax.random.PRNGKey(0)
    k_param, k_x, k_eps = jax.random.split(root, 3)

    params = make_params(k_param, OBS_DIM, ACT_DIM)
    x = jax.random.normal(k_x, (B, OBS_DIM), dtype=jnp.float32)
    # Sampling noise for Normal(mean, std).sample() (the action=None branch).
    eps = jax.random.normal(k_eps, (B, ACT_DIM), dtype=jnp.float32)

    action, logprob, entropy, value = jax.block_until_ready(
        ppo_agent_forward(params, x, eps)   # auto-splits into 2 batch tiles
    )

    # sanity check vs pure-JAX reference
    ra, rlp, rent, rv = _reference(params, x, eps)
    assert jnp.allclose(action, ra, atol=1e-4, rtol=1e-4)
    assert jnp.allclose(logprob, rlp, atol=1e-4, rtol=1e-4)
    assert jnp.allclose(entropy, rent, atol=1e-4, rtol=1e-4)
    assert jnp.allclose(value, rv, atol=1e-4, rtol=1e-4)
    assert action.shape == (B, ACT_DIM)
    assert logprob.shape == (B,)
    assert entropy.shape == (B,)
    assert value.shape == (B, 1)

    print("KERNEL_OK")
</pallas_src>

<mosaic_0001>
module attributes {stable_mosaic.version = 11 : i64} {
  func.func @_ppo_fused_kernel(%arg0: i32, %arg1: memref<32x16xf32, #tpu.memory_space<vmem>>, %arg2: memref<32x8xf32, #tpu.memory_space<vmem>>, %arg3: memref<152x128xf32, #tpu.memory_space<vmem>>, %arg4: memref<136x8xf32, #tpu.memory_space<vmem>>, %arg5: memref<32x8xf32, #tpu.memory_space<vmem>>) attributes {dimension_semantics = [#tpu.dimension_semantics<parallel>], iteration_bounds = array<i64: 2>, scalar_prefetch = 0 : i64, scratch_operands = 0 : i64, tpu.core_type = #tpu.core_type<tc>, window_params = [{transform_indices = @transform_0, window_bounds = array<i64: 32, 16>}, {transform_indices = @transform_1, window_bounds = array<i64: 32, 8>}, {pipeline_mode = #tpu.pipeline_mode<synchronous>, transform_indices = @transform_2, window_bounds = array<i64: 152, 128>}, {pipeline_mode = #tpu.pipeline_mode<synchronous>, transform_indices = @transform_3, window_bounds = array<i64: 136, 8>}, {transform_indices = @transform_4, window_bounds = array<i64: 32, 8>}]} {
    %c0 = arith.constant 0 : index
    %c0_0 = arith.constant 0 : index
    %0 = vector.load %arg3[%c0, %c0_0] : memref<152x128xf32, #tpu.memory_space<vmem>>, vector<16x128xf32>
    %c16 = arith.constant 16 : index
    %c0_1 = arith.constant 0 : index
    %1 = vector.load %arg3[%c16, %c0_1] : memref<152x128xf32, #tpu.memory_space<vmem>>, vector<128x128xf32>
    %c144 = arith.constant 144 : index
    %c0_2 = arith.constant 0 : index
    %2 = vector.load %arg3[%c144, %c0_2] : memref<152x128xf32, #tpu.memory_space<vmem>>, vector<8x128xf32>
    %3 = vector.extract_strided_slice %2 {offsets = [0, 0], sizes = [1, 128], strides = [1, 1]} : vector<8x128xf32> to vector<1x128xf32>
    %4 = vector.extract_strided_slice %2 {offsets = [1, 0], sizes = [1, 128], strides = [1, 1]} : vector<8x128xf32> to vector<1x128xf32>
    %c0_3 = arith.constant 0 : index
    %c0_4 = arith.constant 0 : index
    %5 = vector.load %arg4[%c0_3, %c0_4] : memref<136x8xf32, #tpu.memory_space<vmem>>, vector<128x8xf32>
    %c128 = arith.constant 128 : index
    %c0_5 = arith.constant 0 : index
    %6 = vector.load %arg4[%c128, %c0_5] : memref<136x8xf32, #tpu.memory_space<vmem>>, vector<8x8xf32>
    %7 = vector.extract_strided_slice %6 {offsets = [0, 0], sizes = [1, 8], strides = [1, 1]} : vector<8x8xf32> to vector<1x8xf32>
    %8 = vector.extract_strided_slice %6 {offsets = [1, 0], sizes = [1, 8], strides = [1, 1]} : vector<8x8xf32> to vector<1x8xf32>
    %9 = vector.extract_strided_slice %6 {offsets = [2, 0], sizes = [1, 8], strides = [1, 1]} : vector<8x8xf32> to vector<1x8xf32>
    %c0_6 = arith.constant 0 : index
    %c0_7 = arith.constant 0 : index
    %10 = vector.load %arg1[%c0_6, %c0_7] : memref<32x16xf32, #tpu.memory_space<vmem>>, vector<32x16xf32>
    %c0_8 = arith.constant 0 : index
    %c0_9 = arith.constant 0 : index
    %11 = vector.load %arg2[%c0_8, %c0_9] : memref<32x8xf32, #tpu.memory_space<vmem>>, vector<32x8xf32>
    %cst = arith.constant dense<0.000000e+00> : vector<32x128xf32>
    %12 = tpu.matmul %10, %0, %cst {dimension_numbers = #tpu.dot_dimension_numbers<[1], [0], [0], [1], [0, 0, 1, 1], [], []>} : vector<32x16xf32>, vector<16x128xf32>, vector<32x128xf32> -> vector<32x128xf32>
    %13 = vector.broadcast %3 : vector<1x128xf32> to vector<32x128xf32>
    %14 = arith.addf %12, %13 : vector<32x128xf32>
    %cst_10 = arith.constant 0.000000e+00 : f32
    %15 = vector.broadcast %cst_10 : f32 to vector<32x128xf32>
    %16 = arith.maximumf %14, %15 : vector<32x128xf32>
    %cst_11 = arith.constant dense<0.000000e+00> : vector<32x128xf32>
    %17 = tpu.matmul %16, %1, %cst_11 {dimension_numbers = #tpu.dot_dimension_numbers<[1], [0], [0], [1], [0, 0, 1, 1], [], []>} : vector<32x128xf32>, vector<128x128xf32>, vector<32x128xf32> -> vector<32x128xf32>
    %18 = vector.broadcast %4 : vector<1x128xf32> to vector<32x128xf32>
    %19 = arith.addf %17, %18 : vector<32x128xf32>
    %cst_12 = arith.constant 0.000000e+00 : f32
    %20 = vector.broadcast %cst_12 : f32 to vector<32x128xf32>
    %21 = arith.maximumf %19, %20 : vector<32x128xf32>
    %cst_13 = arith.constant dense<0.000000e+00> : vector<32x8xf32>
    %22 = tpu.matmul %21, %5, %cst_13 {dimension_numbers = #tpu.dot_dimension_numbers<[1], [0], [0], [1], [0, 0, 1, 1], [], []>} : vector<32x128xf32>, vector<128x8xf32>, vector<32x8xf32> -> vector<32x8xf32>
    %23 = vector.broadcast %7 : vector<1x8xf32> to vector<32x8xf32>
    %24 = arith.addf %22, %23 : vector<32x8xf32>
    %25 = vector.broadcast %8 : vector<1x8xf32> to vector<32x8xf32>
    %26 = arith.mulf %25, %11 : vector<32x8xf32>
    %27 = arith.addf %24, %26 : vector<32x8xf32>
    %28 = arith.mulf %11, %11 : vector<32x8xf32>
    %cst_14 = arith.constant -5.000000e-01 : f32
    %29 = vector.broadcast %cst_14 : f32 to vector<32x8xf32>
    %30 = arith.mulf %29, %28 : vector<32x8xf32>
    %cst_15 = arith.constant dense<0.000000e+00> : vector<32xf32>
    %31 = vector.multi_reduction <add>, %30, %cst_15 [1] : vector<32x8xf32> to vector<32xf32>
    %32 = vector.shape_cast %31 : vector<32xf32> to vector<32x1xf32>
    %33 = vector.broadcast %32 : vector<32x1xf32> to vector<32x8xf32>
    %34 = vector.broadcast %9 : vector<1x8xf32> to vector<32x8xf32>
    %35 = arith.mulf %33, %34 : vector<32x8xf32>
    %36 = arith.addf %27, %35 : vector<32x8xf32>
    %c0_16 = arith.constant 0 : index
    %c0_17 = arith.constant 0 : index
    %37 = vector.load %arg5[%c0_16, %c0_17] : memref<32x8xf32, #tpu.memory_space<vmem>>, vector<32x8xf32>
    tpu.vector_store %arg5[%c0_16, %c0_17], %36 {strides = array<i32>} : memref<32x8xf32, #tpu.memory_space<vmem>>, vector<32x8xf32>,
    return
  }
  func.func @transform_0(%arg0: i32) -> (i32, i32) {
    %c0_i32 = arith.constant 0 : i32
    %c0_i32_0 = arith.constant 0 : i32
    return %arg0, %c0_i32 : i32, i32
  }
  func.func @transform_1(%arg0: i32) -> (i32, i32) {
    %c0_i32 = arith.constant 0 : i32
    %c0_i32_0 = arith.constant 0 : i32
    return %arg0, %c0_i32 : i32, i32
  }
  func.func @transform_2(%arg0: i32) -> (i32, i32) {
    %c0_i32 = arith.constant 0 : i32
    %c0_i32_0 = arith.constant 0 : i32
    %c0_i32_1 = arith.constant 0 : i32
    return %c0_i32, %c0_i32_0 : i32, i32
  }
  func.func @transform_3(%arg0: i32) -> (i32, i32) {
    %c0_i32 = arith.constant 0 : i32
    %c0_i32_0 = arith.constant 0 : i32
    %c0_i32_1 = arith.constant 0 : i32
    return %c0_i32, %c0_i32_0 : i32, i32
  }
  func.func @transform_4(%arg0: i32) -> (i32, i32) {
    %c0_i32 = arith.constant 0 : i32
    %c0_i32_0 = arith.constant 0 : i32
    return %arg0, %c0_i32 : i32, i32
  }
}

</mosaic_0001>

<bundles_post_ra>
// kernel: tpu_custom_call.1
= control target key start
LH: loop header
LB: loop body
LE: loop exit
PB: predicated region body
PF: predicated region fallthrough
CT: control target
= control target key end

     0   :  { %s930_s15 = smov 0   ;;  %s1084_s0 = inlined_call_operand.vmem [shape: f32[64,16], index: 0, kind: input, shape index: {}]   ;;  %s1085_s1 = inlined_call_operand.vmem [shape: f32[64,8], index: 1, kind: input, shape index: {}]   ;;  %s1086_s2 = inlined_call_operand.vmem [shape: f32[152,128], index: 2, kind: input, shape index: {}]   ;;  %s1087_s3 = inlined_call_operand.vmem [shape: f32[136,8], index: 3, kind: input, shape index: {}]   ;;  %s1088_s4 = inlined_call_operand.vmem [shape: f32[64,8], index: 4, kind: output, shape index: {}]  }
   0x1 LB: > { %s672_s16 = sadd.s32 4294967295, %s903_s15   ;;  %p676_p0 = scmp.ge.s32.totalorder %s903_s15, 1  ;;  %s903_s15 = sphi %s930_s15, %s14_s15  }
   0x2   : > { %p174_p1 = scmp.lt.s32.totalorder %s903_s15, 3 }
   0x4   : > { %p175_p2 = pnand %p676_p0, %p174_p1 }
   0x5   : > { %v223_v0 = vld [vmem:[%s1086_s2] sm:$0xff] (!%p175_p2)  ;;  %v224_v1 = vld [vmem:[%s1086_s2 + $0x8] sm:$0xff] (!%p175_p2)  ;;  %s677_s21 = sshll.u32 (!%p175_p2), %s672_s16, 2  ;;  %v225_v2 = vld [vmem:[%s1086_s2 + $0x10] sm:$0xff] (!%p175_p2)  ;;  %vm271_vm0 = vcmask (!%p175_p2), 130048   ;;  %v267_v52 = vlaneseq (!%p175_p2)  ;;  %vm575_vm1 = vcmask (!%p175_p2), 64512  }
   0x6   : > { %178 = sbr.rel (%p175_p2) target bundleno = 678 (0x2a6), region = 36  ;;  %v821_v3 = vpack.c.bf16 (!%p175_p2), %v224_v1, %v223_v0  ;;  %p206_p3 = scmp.lt.s32.totalorder (!%p175_p2), %s677_s21, 7  ;;  %v226_v4 = vld [vmem:[%s1086_s2 + $0x18] sm:$0xff] (!%p175_p2)  ;;  %v227_v5 = vld [vmem:[%s1086_s2 + $0x20] sm:$0xff] (!%p175_p2)  ;;  %v228_v6 = vld [vmem:[%s1086_s2 + $0x28] sm:$0xff] (!%p175_p2) }
   0x7   : > { %v825_v7 = vpack.c.bf16 (!%p175_p2), %v226_v4, %v225_v2  ;;  %v829_v8 = vpack.c.bf16 (!%p175_p2), %v228_v6, %v227_v5  ;;  %v229_v9 = vld [vmem:[%s1086_s2 + $0x30] sm:$0xff] (!%p175_p2)  ;;  %v230_v10 = vld [vmem:[%s1086_s2 + $0x38] sm:$0xff] (!%p175_p2)  ;;  %v231_v12 = vld [vmem:[%s1086_s2 + $0x40] sm:$0xff] (!%p175_p2)  ;;  %v1044_v53 = vshrl.u32 (!%p175_p2), %v267_v52, 7 }
   0x8   : > { %822 = vmatprep.subr.bf16.mxu0 (!%p175_p2), %v821_v3  ;;  %v833_v11 = vpack.c.bf16 (!%p175_p2), %v230_v10, %v229_v9  ;;  %v232_v13 = vld [vmem:[%s1086_s2 + $0x48] sm:$0xff] (!%p175_p2)  ;;  %v233_v19 = vld [vmem:[%s1086_s2 + $0x50] sm:$0xff] (!%p175_p2)  ;;  %v234_v20 = vld [vmem:[%s1086_s2 + $0x58] sm:$0xff] (!%p175_p2) }
   0x9   : > { %824 = vmatpush3.bf16.msra.mxu0 (!%p175_p2), %v821_v3  ;;  %826 = vmatprep.subr.bf16.mxu1 (!%p175_p2), %v825_v7  ;;  %v837_v18 = vpack.c.bf16 (!%p175_p2), %v232_v13, %v231_v12  ;;  %v841_v21 = vpack.c.bf16 (!%p175_p2), %v234_v20, %v233_v19  ;;  %v235_v22 = vld [vmem:[%s1086_s2 + $0x60] sm:$0xff] (!%p175_p2)  ;;  %v236_v23 = vld [vmem:[%s1086_s2 + $0x68] sm:$0xff] (!%p175_p2)  ;;  %v237_v25 = vld [vmem:[%s1086_s2 + $0x70] sm:$0xff] (!%p175_p2)  ;;  %v269_v54 = vsub.s32 (!%p175_p2), 0, %v1044_v53 }
   0xa   : > { %828 = vmatpush3.bf16.msra.mxu1 (!%p175_p2), %v825_v7  ;;  %v845_v24 = vpack.c.bf16 (!%p175_p2), %v236_v23, %v235_v22  ;;  %v238_v26 = vld [vmem:[%s1086_s2 + $0x78] sm:$0xff] (!%p175_p2)  ;;  %v239_v28 = vld [vmem:[%s1086_s2 + $0x80] sm:$0xff] (!%p175_p2)  ;;  %v240_v29 = vld [vmem:[%s1086_s2 + $0x88] sm:$0xff] (!%p175_p2) }
   0xb   : > { %830 = vmatprep.subr.bf16.mxu1 (!%p175_p2), %v829_v8  ;;  %v849_v27 = vpack.c.bf16 (!%p175_p2), %v238_v26, %v237_v25  ;;  %v853_v30 = vpack.c.bf16 (!%p175_p2), %v240_v29, %v239_v28  ;;  %v242_v31 = vld [vmem:[%s1087_s3] sm:$0xff] (!%p175_p2)  ;;  %v243_v32 = vld [vmem:[%s1087_s3 + $0x8] sm:$0xff] (!%p175_p2)  ;;  %v244_v33 = vld [vmem:[%s1087_s3 + $0x10] sm:$0xff] (!%p175_p2) }
   0xc   : > { %v857_v34 = vpack.c.bf16 (!%p175_p2), %v243_v32, %v242_v31  ;;  %v245_v35 = vld [vmem:[%s1087_s3 + $0x18] sm:$0xff] (!%p175_p2)  ;;  %v246_v37 = vld [vmem:[%s1087_s3 + $0x20] sm:$0xff] (!%p175_p2)  ;;  %v247_v38 = vld [vmem:[%s1087_s3 + $0x28] sm:$0xff] (!%p175_p2) }
   0xd   : > { %s1090_s21 = smov (!%p206_p3, %s677_s21), 7  ;;  %v861_v36 = vpack.c.bf16 %v245_v35, %v244_v33  ;;  %v865_v39 = vpack.c.bf16 %v247_v38, %v246_v37  ;;  %v248_v40 = vld [vmem:[%s1087_s3 + $0x30] sm:$0xff]  ;;  %v249_v41 = vld [vmem:[%s1087_s3 + $0x38] sm:$0xff]  ;;  %v250_v43 = vld [vmem:[%s1087_s3 + $0x40] sm:$0xff] }
   0xe   : > { %s962_s8 = sshll.u32 %s1090_s21, 3  ;;  %832 = vmatpush3.bf16.msra.mxu1 %v829_v8  ;;  %858 = vmatprep.subr.bf16.mxu0 %v857_v34  ;;  %v869_v42 = vpack.c.bf16 %v249_v41, %v248_v40  ;;  %v251_v44 = vld [vmem:[%s1087_s3 + $0x48] sm:$0xff]  ;;  %v252_v46 = vld [vmem:[%s1087_s3 + $0x50] sm:$0xff]  ;;  %v253_v47 = vld [vmem:[%s1087_s3 + $0x58] sm:$0xff] }
   0xf   : > { %s209_s11 = scalar_lea.vmem %s1084_s0, %s962_s8  ;;  %834 = vmatprep.subr.bf16.mxu1 %v833_v11  ;;  %v873_v45 = vpack.c.bf16 %v251_v44, %v250_v43  ;;  %v877_v48 = vpack.c.bf16 %v253_v47, %v252_v46  ;;  %v254_v49 = vld [vmem:[%s1087_s3 + $0x60] sm:$0xff]  ;;  %v255_v50 = vld [vmem:[%s1087_s3 + $0x68] sm:$0xff]  ;;  %v241_v55 = vld [vmem:[%s1086_s2 + $0x90] sm:$0xff]  ;;  %s215_s21 = scalar_lea.vmem %s1085_s1, %s962_s8 }
  0x10   : > { %v259_v14 = vld [vmem:[%s209_s11] sm:$0xff]  ;;  %v260_v15 = vld [vmem:[%s209_s11 + $0x8] sm:$0xff]  ;;  %v261_v16 = vld [vmem:[%s209_s11 + $0x10] sm:$0xff]  ;;  %v881_v51 = vpack.c.bf16 %v255_v50, %v254_v49  ;;  %v270_v56 = vrot.slane %v241_v55, %v269_v54  ;;  %s221_s26 = scalar_lea.vmem %s1088_s4, %s962_s8 }
  0x11   : > { %739 = vmatprep.mubr.msk.f32.mxu0 %vm271_vm0, %v259_v14  ;;  %v262_v17 = vld [vmem:[%s209_s11 + $0x18] sm:$0xff]  ;;  %v256_v5 = vld [vmem:[%s1087_s3 + $0x70] sm:$0xff]  ;;  %v263_v8 = vld [vmem:[%s215_s21] sm:$0xff] }
  0x12   : > { %740 = vmatmul.mubr.msk.f32.vlgmr.msra.gmra.mrb[0].mxu0 %vm271_vm0, %v260_v15  ;;  %836 = vmatpush3.bf16.msra.mxu1 %v833_v11  ;;  %v257_v6 = vld [vmem:[%s1087_s3 + $0x78] sm:$0xff]  ;;  %v265_v9 = vld [vmem:[%s215_s21 + $0x10] sm:$0xff]  ;;  %v264_v10 = vld [vmem:[%s215_s21 + $0x8] sm:$0xff]  ;;  %v567_v11 = vmul.f32 %v263_v8, %v263_v8 }
  0x13   : > { %742 = vmatprep.mubr.msk.f32.mxu0 %vm271_vm0, %v261_v16  ;;  %838 = vmatprep.subr.bf16.mxu1 %v837_v18  ;;  %v885_v7 = vpack.c.bf16 %v257_v6, %v256_v5  ;;  %v569_v12 = vmul.f32 %v265_v9, %v265_v9  ;;  %v568_v13 = vmul.f32 %v264_v10, %v264_v10  ;;  %v266_v14 = vld [vmem:[%s215_s21 + $0x18] sm:$0xff]  ;;  %v258_v38 = vld [vmem:[%s1087_s3 + $0x80] sm:$0xff] }
  0x14   : > { %860 = vmatpush3.bf16.msra.mxu0 %v857_v34  ;;  %v570_v15 = vmul.f32 %v266_v14, %v266_v14  ;;  %v571_v16 = vmul.f32 -0.5, %v567_v11 }
  0x15   : > { %862 = vmatprep.subr.bf16.mxu0 %v861_v36 }
  0x16   : > { %743 = vmatmul.mubr.msk.f32.gmra.mrb[2].mxu0 %vm271_vm0, %v262_v17  ;;  %840 = vmatpush3.bf16.msra.mxu1 %v837_v18  ;;  %v573_v17 = vmul.f32 -0.5, %v569_v12  ;;  %v572_v18 = vmul.f32 -0.5, %v568_v13  ;;  %v574_v19 = vmul.f32 -0.5, %v570_v15  ;;  %v576_v20 = vsel %vm575_vm1, %v571_v16, 0.0 }
  0x17   : > { %842 = vmatprep.subr.bf16.mxu1 %v841_v21  ;;  %577 = vadd.xlane.f32.xlu0 %v576_v20 }
  0x18   : > { %864 = vmatpush3.bf16.msra.mxu0 %v861_v36  ;;  %v579_v22 = vsel %vm575_vm1, %v572_v18, 0.0  ;;  %v585_v23 = vsel %vm575_vm1, %v574_v19, 0.0 }
  0x19   : > { %866 = vmatprep.subr.bf16.mxu0 %v865_v39 }
  0x1a   : > { %844 = vmatpush3.bf16.msra.mxu1 %v841_v21  ;;  %v582_v21 = vsel %vm575_vm1, %v573_v17, 0.0 }
  0x1b   : > { %846 = vmatprep.subr.bf16.mxu1 %v845_v24  ;;  %583 = vadd.xlane.f32.xlu1 %v582_v21 }
  0x1c   : > { %868 = vmatpush3.bf16.msra.mxu0 %v865_v39  ;;  %580 = vadd.xlane.f32.xlu0 %v579_v22  ;;  %v590_v39 = vsub.s32 2, %v1044_v53 }
  0x1d   : > { %870 = vmatprep.subr.bf16.mxu0 %v869_v42 }
  0x1e   : > { %848 = vmatpush3.bf16.msra.mxu1 %v845_v24  ;;  %v375_v24 = vsub.s32 1, %v1044_v53  ;;  %v591_v43 = vrot.slane %v258_v38, %v590_v39 }
  0x1f   : > { %850 = vmatprep.subr.bf16.mxu1 %v849_v27  ;;  %586 = vadd.xlane.f32.xlu1 %v585_v23 }
  0x20   : > { %872 = vmatpush3.bf16.msra.mxu0 %v869_v42  ;;  %v376_v25 = vrot.slane %v241_v55, %v375_v24  ;;  %v558_v41 = vrot.slane %v258_v38, %v375_v24  ;;  %v469_v42 = vrot.slane %v258_v38, %v269_v54 }
  0x21   : > { %874 = vmatprep.subr.bf16.mxu0 %v873_v45 }
  0x22   : > { %852 = vmatpush3.bf16.msra.mxu1 %v849_v27  ;;  %v559_v46 = vmul.f32 %v558_v41, %v263_v8 }
  0x23   : > { %854 = vmatprep.subr.bf16.mxu1 %v853_v30 }
  0x24   : > { %876 = vmatpush3.bf16.msra.mxu0 %v873_v45  ;;  %v560_v45 = vmul.f32 %v558_v41, %v264_v10 }
  0x25   : > { %878 = vmatprep.subr.bf16.mxu0 %v877_v48 }
  0x26   : > { %856 = vmatpush3.bf16.msra.mxu1 %v853_v30 }
  0x28   : > { %880 = vmatpush3.bf16.msra.mxu0 %v877_v48 }
  0x29   : > { %882 = vmatprep.subr.bf16.mxu0 %v881_v51 }
  0x2c   : > { %884 = vmatpush3.bf16.msra.mxu0 %v881_v51 }
  0x2d   : > { %886 = vmatprep.subr.bf16.mxu0 %v885_v7 }
  0x30   : > { %888 = vmatpush3.bf16.msra.mxu0 %v885_v7 }
  0xa4   : > { %v578_v40 = vpop.xlane.xlu0 %577 }
  0xa5   : > { %v592_v51 = vmul.f32 %v591_v43, %v578_v40 }
  0xa8   : > { %v584_v44 = vpop.xlane.xlu1 %583 }
  0xa9   : > { %v581_v48 = vpop.xlane.xlu0 %580 }
  0xe5   : > { %v741_v57 = vpop.f32.mrb[0].mxu0 }
  0xe6   : > { %v356_v58 = vadd.f32 %v741_v57, %v270_v56  ;;  %v350_v59 = vpop.f32.mrb[1].mxu0  ;;  %v562_v57 = vmul.f32 %v558_v41, %v266_v14 }
  0xe7   : > { %v351_v60 = vadd.f32 %v350_v59, %v270_v56 }
  0xe8   : > { %v370_v63 = vmax.f32 %v356_v58, 0.0  ;;  %v561_v58 = vmul.f32 %v558_v41, %v265_v9 }
  0xe9   : > { %v744_v61 = vpop.f32.mrb[2].mxu0  ;;  %v369_v62 = vmax.f32 %v351_v60, 0.0 }
  0xea   : > { %v366_v0 = vadd.f32 %v744_v61, %v270_v56  ;;  %v360_v1 = vpop.f32.mrb[3].mxu0  ;;  %v587_v61 = vpop.xlane.xlu1 %586 }
  0xeb   : > { %v361_v2 = vadd.f32 %v360_v1, %v270_v56  ;;  %777 = vmatprep.mubr.f32.mxu1 %v369_v62  ;;  %v593_v56 = vmul.f32 %v591_v43, %v581_v48 }
  0xec   : > { %778 = vmatmul.mubr.f32.vlgmr.msra.gmra.mrb[0].mxu1 %v370_v63  ;;  %v372_v4 = vmax.f32 %v366_v0, 0.0 }
  0xed   : > { %v371_v3 = vmax.f32 %v361_v2, 0.0  ;;  %v595_v2 = vmul.f32 %v591_v43, %v587_v61 }
  0xef   : > { %780 = vmatprep.mubr.f32.mxu1 %v371_v3  ;;  %v594_v3 = vmul.f32 %v591_v43, %v584_v44 }
  0xf0   : > { %781 = vmatmul.mubr.f32.gmra.mrb[2].mxu1 %v372_v4 }
 0x1bf   : > { %v779_v26 = vpop.f32.mrb[0].mxu1 }
 0x1c0   : > { %v449_v27 = vadd.f32 %v779_v26, %v376_v25  ;;  %v443_v28 = vpop.f32.mrb[1].mxu1 }
 0x1c1   : > { %v444_v29 = vadd.f32 %v443_v28, %v376_v25 }
 0x1c2   : > { %v463_v32 = vmax.f32 %v449_v27, 0.0 }
 0x1c3   : > { %v462_v30 = vmax.f32 %v444_v29, 0.0  ;;  %v782_v31 = vpop.f32.mrb[2].mxu1 }
 0x1c4   : > { %v459_v33 = vadd.f32 %v782_v31, %v376_v25  ;;  %v453_v34 = vpop.f32.mrb[3].mxu1 }
 0x1c5   : > { %v454_v35 = vadd.f32 %v453_v34, %v376_v25  ;;  %815 = vmatprep.mubr.f32.mxu0 %v462_v30 }
 0x1c6   : > { %816 = vmatmul.mubr.f32.vlgmr.msra.gmra.mrb[4].mxu0 %v463_v32  ;;  %v465_v37 = vmax.f32 %v459_v33, 0.0 }
 0x1c7   : > { %v464_v36 = vmax.f32 %v454_v35, 0.0 }
 0x1c9   : > { %818 = vmatprep.mubr.f32.mxu0 %v464_v36 }
 0x1ca   : > { %819 = vmatmul.mubr.f32.gmra.mrb[6].mxu0 %v465_v37 }
 0x299   : > { %v817_v47 = vpop.f32.mrb[4].mxu0 }
 0x29a   : > { %v542_v49 = vadd.f32 %v817_v47, %v469_v42  ;;  %v536_v50 = vpop.f32.mrb[5].mxu0 }
 0x29b   : > { %v537_v52 = vadd.f32 %v536_v50, %v469_v42 }
 0x29c   : > { %v564_v55 = vadd.f32 %v560_v45, %v542_v49 }
 0x29d   : > { %v563_v59 = vadd.f32 %v559_v46, %v537_v52  ;;  %v820_v60 = vpop.f32.mrb[6].mxu0 }
 0x29e   : > { %v552_v53 = vadd.f32 %v820_v60, %v469_v42  ;;  %v546_v54 = vpop.f32.mrb[7].mxu0  ;;  %v597_v0 = vadd.f32 %v593_v56, %v564_v55 }
 0x29f   : > { %v596_v62 = vadd.f32 %v592_v51, %v563_v59  ;;  %v547_v63 = vadd.f32 %v546_v54, %v469_v42 }
 0x2a0   : > { %v566_v1 = vadd.f32 %v562_v57, %v552_v53  ;;  %601 = vst.msk [vmem:[%s221_s26 + $0x8] sm:$0xff] %vm575_vm1, %v597_v0 }
 0x2a1   : > { %600 = vst.msk [vmem:[%s221_s26] sm:$0xff] %vm575_vm1, %v596_v62  ;;  %v565_v4 = vadd.f32 %v561_v58, %v547_v63 }
 0x2a2   : > { %v599_v6 = vadd.f32 %v595_v2, %v566_v1 }
 0x2a3   : > { %v598_v5 = vadd.f32 %v594_v3, %v565_v4 }
 0x2a4   : > { %603 = vst.msk [vmem:[%s221_s26 + $0x18] sm:$0xff] %vm575_vm1, %v599_v6 }
 0x2a5   : > { %602 = vst.msk [vmem:[%s221_s26 + $0x10] sm:$0xff] %vm575_vm1, %v598_v5 }
 0x2a6 PF: > { %s14_s15 = sadd.s32 1, %s903_s15  }
 0x2a7   : > { %p11_p4 = scmp.ge.s32.totalorder %s14_s15, 4  }
 0x2a9   :  { %13 = sbr.rel (!%p11_p4) target bundleno = 1 (0x1), region = 69 }

</bundles_post_ra>
